<compile_context>
chip_gen: v5e
topology: v5e:2x2
jax: 0.10.0
libtpu: 0.0.40
codegen_flags: <defaults>
</compile_context>

<pallas_src>
import functools

import jax
import jax.numpy as jnp
from jax.experimental import pallas as pl
from jax.experimental.pallas import tpu as pltpu


def _round_up(x, m):
    return (x + m - 1) // m * m


def _value_critic_kernel(x_ref, w1_ref, b1_ref, w2_ref, b2_ref, out_ref):
    """Fused: h = relu(x @ W1 + b1); out = h @ W2 + b2.

    x/W1/W2 are bf16 (MXU feed), biases and accumulation are f32 (VPU).
    """
    h = jnp.dot(x_ref[...], w1_ref[...], preferred_element_type=jnp.float32)
    h = jnp.maximum(h + b1_ref[...], 0.0)
    # NOTE: for values == 1 this second matmul could be a VPU/XLU reduction
    # (sum(h * w2_col)) to skip the lane-padded weight; the MXU matmul is kept
    # because it stays general for values > 1 and the output block is already
    # lane-dense for unmasked stores.
    out = jnp.dot(h.astype(w2_ref.dtype), w2_ref[...],
                  preferred_element_type=jnp.float32) + b2_ref[...]
    out_ref[...] = out.astype(out_ref.dtype)


def value_critic_forward(x, w1, b1, w2, b2, *, values, tile_b=128):
    """Fused ValueCritic forward.

    x : (B, F) f32         input features
    w1: (F, H) f32         neural_module stand-in weight (pre-transposed (in,out))
    b1: (H,)   f32
    w2: (H, values) f32    output_layer weight (pre-transposed (in,out))
    b2: (values,) f32
    returns (B, values) f32
    """
    B, F = x.shape
    H = w1.shape[1]
    assert w1.shape[0] == F and w2.shape[0] == H and w2.shape[1] == values

    # Lane-dense padding (last dims -> multiples of 128), batch -> tile_b rows.
    Fp = _round_up(F, 128)
    Hp = _round_up(H, 128)
    Vp = _round_up(values, 128)
    tile_b = min(tile_b, _round_up(B, 8))
    Bp = _round_up(B, tile_b)

    f32, bf16 = jnp.float32, jnp.bfloat16
    xp = jnp.zeros((Bp, Fp), bf16).at[:B, :F].set(x.astype(bf16))
    w1p = jnp.zeros((Fp, Hp), bf16).at[:F, :H].set(w1.astype(bf16))
    b1p = jnp.zeros((1, Hp), f32).at[0, :H].set(b1.reshape(-1).astype(f32))
    w2p = jnp.zeros((Hp, Vp), bf16).at[:H, :values].set(w2.astype(bf16))
    b2p = jnp.zeros((1, Vp), f32).at[0, :values].set(b2.reshape(-1).astype(f32))

    # VMEM budget: double-buffered x/out tiles, single-buffered weights, plus
    # the f32 intermediate h.  2x headroom, capped at 64 MiB (v7x physical).
    vmem_bytes = (2 * tile_b * Fp * 2          # x tiles (bf16, double-buffered)
                  + Fp * Hp * 2 + Hp * 4       # w1 + b1 (single-buffered)
                  + Hp * Vp * 2 + Vp * 4       # w2 + b2 (single-buffered)
                  + 2 * tile_b * Vp * 4        # out tiles (f32, double-buffered)
                  + tile_b * Hp * 4)           # h intermediate (f32)
    vmem_limit = int(min(max(2 * vmem_bytes, 8 * 1024 * 1024),
                         64 * 1024 * 1024))

    weight_buf = pl.Buffered(1)  # grid-invariant: no double-buffering needed

    out_padded = pl.pallas_call(
        _value_critic_kernel,
        out_shape=jax.ShapeDtypeStruct((Bp, Vp), f32),
        grid_spec=pltpu.PrefetchScalarGridSpec(
            num_scalar_prefetch=0,
            grid=(Bp // tile_b,),
            in_specs=[
                pl.BlockSpec((tile_b, Fp), lambda i: (i, 0)),
                pl.BlockSpec((Fp, Hp), lambda i: (0, 0), pipeline_mode=weight_buf),
                pl.BlockSpec((1, Hp), lambda i: (0, 0), pipeline_mode=weight_buf),
                pl.BlockSpec((Hp, Vp), lambda i: (0, 0), pipeline_mode=weight_buf),
                pl.BlockSpec((1, Vp), lambda i: (0, 0), pipeline_mode=weight_buf),
            ],
            out_specs=pl.BlockSpec((tile_b, Vp), lambda i: (i, 0)),
        ),
        compiler_params=pltpu.CompilerParams(
            dimension_semantics=("parallel",),
            vmem_limit_bytes=vmem_limit,
        ),
    )(xp, w1p, b1p, w2p, b2p)

    # Strip batch padding and the lane-padded value columns.
    return out_padded[:B, :values]


def _kaiming_normal(key, shape):
    # torch.nn.init.kaiming_normal_ default: fan_in mode, gain = sqrt(2).
    # Weights are stored pre-transposed as (in_features, out_features),
    # so fan_in = shape[0].
    fan_in = shape[0]
    std = (2.0 / fan_in) ** 0.5
    return std * jax.random.normal(key, shape, dtype=jnp.float32)


if __name__ == "__main__":
    # Shapes consistent with the module: input features=32,
    # neural_module.output_dimension=(32,), values=1.  Batch=256 so the grid
    # has 2 parallel 128-row steps (keeps both v7x TensorCores busy).
    B, F, H, VALUES = 256, 32, 32, 1

    key = jax.random.PRNGKey(0)
    k_x, k_w1, k_b1, k_w2, k_b2 = jax.random.split(key, 5)

    x = jax.random.normal(k_x, (B, F), dtype=jnp.float32)

    # neural_module stand-in params (Kaiming for dim>1, small uniform bias).
    w1 = _kaiming_normal(k_w1, (F, H))
    b1 = (jax.random.uniform(k_b1, (H,), dtype=jnp.float32) - 0.5) * 0.1

    # ValueCritic.output_layer: Linear(_input_size, values)
    input_size = functools.reduce(lambda a, b: a * b, (H,), 1)
    w2 = _kaiming_normal(k_w2, (input_size, VALUES))
    b2 = (jax.random.uniform(k_b2, (VALUES,), dtype=jnp.float32) - 0.5) * 0.1

    out = value_critic_forward(x, w1, b1, w2, b2, values=VALUES)
    out = jax.block_until_ready(out)
    assert out.shape == (B, VALUES)

    # Pure-JAX reference with matching bf16-matmul / f32-accumulate numerics.
    xb, w1b, w2b = (t.astype(jnp.bfloat16) for t in (x, w1, w2))
    h_ref = jnp.maximum(
        jnp.dot(xb, w1b, preferred_element_type=jnp.float32) + b1[None, :], 0.0)
    ref = jnp.dot(h_ref.astype(jnp.bfloat16), w2b,
                  preferred_element_type=jnp.float32) + b2[None, :]
    assert jnp.allclose(out, ref, atol=2e-2, rtol=2e-2), \
        float(jnp.max(jnp.abs(out - ref)))

    # TODO(synk): the real neural_module is user-supplied (possibly recurrent);
    # only its Linear+ReLU stand-in plus the ValueCritic output_layer are fused.
    print("KERNEL_OK")
</pallas_src>

<mosaic_0001>
module attributes {stable_mosaic.version = 11 : i64} {
  func.func @_value_critic_kernel(%arg0: i32, %arg1: memref<128x128xbf16, #tpu.memory_space<vmem>>, %arg2: memref<128x128xbf16, #tpu.memory_space<vmem>>, %arg3: memref<1x128xf32, #tpu.memory_space<vmem>>, %arg4: memref<128x128xbf16, #tpu.memory_space<vmem>>, %arg5: memref<1x128xf32, #tpu.memory_space<vmem>>, %arg6: memref<128x128xf32, #tpu.memory_space<vmem>>) attributes {dimension_semantics = [#tpu.dimension_semantics<parallel>], iteration_bounds = array<i64: 2>, scalar_prefetch = 0 : i64, scratch_operands = 0 : i64, tpu.core_type = #tpu.core_type<tc>, window_params = [{transform_indices = @transform_0, window_bounds = array<i64: 128, 128>}, {pipeline_mode = #tpu.pipeline_mode<synchronous>, transform_indices = @transform_1, window_bounds = array<i64: 128, 128>}, {pipeline_mode = #tpu.pipeline_mode<synchronous>, transform_indices = @transform_2, window_bounds = array<i64: 1, 128>}, {pipeline_mode = #tpu.pipeline_mode<synchronous>, transform_indices = @transform_3, window_bounds = array<i64: 128, 128>}, {pipeline_mode = #tpu.pipeline_mode<synchronous>, transform_indices = @transform_4, window_bounds = array<i64: 1, 128>}, {transform_indices = @transform_5, window_bounds = array<i64: 128, 128>}]} {
    %c0 = arith.constant 0 : index
    %c0_0 = arith.constant 0 : index
    %0 = vector.load %arg1[%c0, %c0_0] : memref<128x128xbf16, #tpu.memory_space<vmem>>, vector<128x128xbf16>
    %c0_1 = arith.constant 0 : index
    %c0_2 = arith.constant 0 : index
    %1 = vector.load %arg2[%c0_1, %c0_2] : memref<128x128xbf16, #tpu.memory_space<vmem>>, vector<128x128xbf16>
    %cst = arith.constant dense<0.000000e+00> : vector<128x128xf32>
    %2 = tpu.matmul %0, %1, %cst {dimension_numbers = #tpu.dot_dimension_numbers<[1], [0], [0], [1], [0, 0, 1, 1], [], []>} : vector<128x128xbf16>, vector<128x128xbf16>, vector<128x128xf32> -> vector<128x128xf32>
    %c0_3 = arith.constant 0 : index
    %c0_4 = arith.constant 0 : index
    %3 = vector.load %arg3[%c0_3, %c0_4] : memref<1x128xf32, #tpu.memory_space<vmem>>, vector<1x128xf32>
    %4 = vector.broadcast %3 : vector<1x128xf32> to vector<128x128xf32>
    %5 = arith.addf %2, %4 : vector<128x128xf32>
    %cst_5 = arith.constant 0.000000e+00 : f32
    %6 = vector.broadcast %cst_5 : f32 to vector<128x128xf32>
    %7 = arith.maximumf %5, %6 : vector<128x128xf32>
    %8 = arith.truncf %7 : vector<128x128xf32> to vector<128x128xbf16>
    %c0_6 = arith.constant 0 : index
    %c0_7 = arith.constant 0 : index
    %9 = vector.load %arg4[%c0_6, %c0_7] : memref<128x128xbf16, #tpu.memory_space<vmem>>, vector<128x128xbf16>
    %cst_8 = arith.constant dense<0.000000e+00> : vector<128x128xf32>
    %10 = tpu.matmul %8, %9, %cst_8 {dimension_numbers = #tpu.dot_dimension_numbers<[1], [0], [0], [1], [0, 0, 1, 1], [], []>} : vector<128x128xbf16>, vector<128x128xbf16>, vector<128x128xf32> -> vector<128x128xf32>
    %c0_9 = arith.constant 0 : index
    %c0_10 = arith.constant 0 : index
    %11 = vector.load %arg5[%c0_9, %c0_10] : memref<1x128xf32, #tpu.memory_space<vmem>>, vector<1x128xf32>
    %12 = vector.broadcast %11 : vector<1x128xf32> to vector<128x128xf32>
    %13 = arith.addf %10, %12 : vector<128x128xf32>
    %c0_11 = arith.constant 0 : index
    %c0_12 = arith.constant 0 : index
    %14 = vector.load %arg6[%c0_11, %c0_12] : memref<128x128xf32, #tpu.memory_space<vmem>>, vector<128x128xf32>
    tpu.vector_store %arg6[%c0_11, %c0_12], %13 {strides = array<i32>} : memref<128x128xf32, #tpu.memory_space<vmem>>, vector<128x128xf32>,
    return
  }
  func.func @transform_0(%arg0: i32) -> (i32, i32) {
    %c0_i32 = arith.constant 0 : i32
    %c0_i32_0 = arith.constant 0 : i32
    return %arg0, %c0_i32 : i32, i32
  }
  func.func @transform_1(%arg0: i32) -> (i32, i32) {
    %c0_i32 = arith.constant 0 : i32
    %c0_i32_0 = arith.constant 0 : i32
    %c0_i32_1 = arith.constant 0 : i32
    return %c0_i32, %c0_i32_0 : i32, i32
  }
  func.func @transform_2(%arg0: i32) -> (i32, i32) {
    %c0_i32 = arith.constant 0 : i32
    %c0_i32_0 = arith.constant 0 : i32
    %c0_i32_1 = arith.constant 0 : i32
    return %c0_i32, %c0_i32_0 : i32, i32
  }
  func.func @transform_3(%arg0: i32) -> (i32, i32) {
    %c0_i32 = arith.constant 0 : i32
    %c0_i32_0 = arith.constant 0 : i32
    %c0_i32_1 = arith.constant 0 : i32
    return %c0_i32, %c0_i32_0 : i32, i32
  }
  func.func @transform_4(%arg0: i32) -> (i32, i32) {
    %c0_i32 = arith.constant 0 : i32
    %c0_i32_0 = arith.constant 0 : i32
    %c0_i32_1 = arith.constant 0 : i32
    return %c0_i32, %c0_i32_0 : i32, i32
  }
  func.func @transform_5(%arg0: i32) -> (i32, i32) {
    %c0_i32 = arith.constant 0 : i32
    %c0_i32_0 = arith.constant 0 : i32
    return %arg0, %c0_i32 : i32, i32
  }
}

</mosaic_0001>

<bundles_post_ra>
// kernel: tpu_custom_call.1
= control target key start
LH: loop header
LB: loop body
LE: loop exit
PB: predicated region body
PF: predicated region fallthrough
CT: control target
= control target key end

     0   :  { %10 = vsyncpa [#allocation3], 0  ;;  %s1339_s0 = inlined_call_operand.hbm [shape: bf16[256,128], index: 0, kind: input, shape index: {}]   ;;  %s1340_s1 = inlined_call_operand.hbm [shape: bf16[128,128], index: 1, kind: input, shape index: {}]   ;;  %s1341_s2 = inlined_call_operand.vmem [shape: f32[1,128], index: 2, kind: input, shape index: {}]   ;;  %s1342_s3 = inlined_call_operand.hbm [shape: bf16[128,128], index: 3, kind: input, shape index: {}]   ;;  %s1343_s4 = inlined_call_operand.vmem [shape: f32[1,128], index: 4, kind: input, shape index: {}]   ;;  %s1344_s5 = inlined_call_operand.hbm [shape: f32[256,128], index: 5, kind: output, shape index: {}]  }
   0x1   :  { %12 = vsyncpa [#allocation3 + $0x1], 0 }
   0x2   :  { %13 = vsyncpa [#allocation6], 0 }
   0x3   :  { %14 = vsyncpa [#allocation4], 0 }
   0x4   :  { %16 = vsyncpa [#allocation4 + $0x1], 0  ;;  %s1153_s18 = smov 0   ;;  %s1155_s19 = smov 0  }
   0x5   :  { %s1157_s20 = smov 0   ;;  %s1159_s21 = smov 0  }
   0x6 LB: > { %s1174_s22 = sadd.s32 4294967295, %s1115_s21   ;;  %s726_s23 = sadd.s32 4294967294, %s1115_s21   ;;  %s1115_s21 = sphi %s1159_s21, %s1356_s21   ;;  %s1111_s20 = sphi %s1157_s20, %s1355_s20   ;;  %s1107_s19 = sphi %s1155_s19, %s1354_s19   ;;  %s1103_s18 = sphi %s1153_s18, %s1353_s18  }
   0x7   : > { %p42_p0 = scmp.ne.s32.totalorder %s1107_s19, %s1103_s18  ;;  %p43_p1 = scmp.eq.s32.totalorder %s1174_s22, 0 }
   0x8   : > { %p150_p2 = scmp.eq.s32.totalorder %s1174_s22, 1  ;;  %p156_p3 = scmp.eq.s32.totalorder %s726_s23, 1 }
   0x9   : > { %p1183_p4 = por %p43_p1, %p42_p0  ;;  %p727_p5 = scmp.ge.s32.totalorder %s1115_s21, 1 }
   0xa   : > { %p1188_p6 = por %p156_p3, %p42_p0  ;;  %p163_p7 = scmp.lt.s32.totalorder %s1115_s21, 3 }
   0xb   : > { %s174_s28 = sshll.u32 %s1340_s1, 4  ;;  %s1117_s30 = smov [#allocation5]   ;;  %s175_s28 = int_to_ptr.hbm [resolvable:$true] %s174_s28 }
   0xc   : > { %p1196_p8 = pnand %p727_p5, %p163_p7  ;;  %s176_s6 = sshll.u32 %s1117_s30, 4  ;;  %s177_s6 = int_to_ptr.vmem [resolvable:$true] %s176_s6 }
   0xd   : > { %s191_s9 = sshll.u32 %s1342_s3, 4  ;;  %s1345_s10 = smov 64   ;;  %s192_s9 = int_to_ptr.hbm [resolvable:$true] %s191_s9 }
   0xe   : > { %p894_p9 = pneg %p1196_p8  ;;  %s1119_s11 = smov 4  }
   0xf   : > { %s1120_s12 = smov [#allocation7]   ;;  %s1215_s14 = sadd.s32 1, %s1115_s21  }
  0x10   : > { %p895_p10 = pnand %p894_p9, %p43_p1  ;;  %s193_s13 = sshll.u32 %s1120_s12, 4  ;;  %s194_s13 = int_to_ptr.vmem [resolvable:$true] %s193_s13 }
  0x11   : > { %s29_s15 = sadd.s32 1, %s1111_s20  ;;  %s26_s16 = ssub.s32 %s1115_s21, %s1215_s14 }
  0x12   : > { %897 = dma.hbm_to_vmem [thread:$0]  (!%p895_p10), %s175_s28, 1024, %s177_s6, [#allocation6], %s1345_s10, %s1345_s10, %s1119_s11  }
  0x13   : > { %900 = dma.hbm_to_vmem [thread:$0]  (!%p895_p10), %s192_s9, 1024, %s194_s13, [#allocation6], %s1345_s10, %s1345_s10, %s1119_s11  }
  0x14   : > { %p36_p12 = scmp.ne.s32.totalorder %s1111_s20, %s1107_s19  ;;  %p27_p13 = scmp.eq.s32.totalorder %s26_s16, 0 }
  0x15   : > { %p37_p0 = scmp.eq.s32.totalorder %s1115_s21, 0  ;;  %p911_p5 = scmp.lt.s32.totalorder %s1115_s21, 2 }
  0x16   : > { %p1225_p3 = por %p150_p2, %p36_p12  ;;  %s210_s26 = sand.u32 1, %s1111_s20  }
  0x17   : > { %s1231_s23 = scalar_select %p27_p13, %s1111_s20, %s29_s15  }
  0x18   : > { %p38_p7 = por %p37_p0, %p36_p12  ;;  %s731_s27 = sshll.u32 %s210_s26, 6 }
  0x19   : > { %s840_s28 = sshll.u32 %s1115_s21, 6  ;;  %s214_s8 = scalar_lea.vmem [#allocation2], %s731_s27 }
  0x1a   : > { %s219_s7 = scalar_lea.hbm %s1339_s0, %s840_s28  ;;  %s222_s9 = sshll.u32 %s214_s8, 4  ;;  %s223_s9 = int_to_ptr.vmem [resolvable:$true] %s222_s9 }
  0x1b   : > { %s220_s12 = sshll.u32 %s219_s7, 4  ;;  %p1238_p2 = pnand %p911_p5, %p38_p7  ;;  %s221_s12 = int_to_ptr.hbm [resolvable:$true] %s220_s12 }
  0x1c   : > { %s211_s15 = scalar_lea.sflag [#allocation3], %s210_s26  ;;  %s1015_s16 = sshra.s32 %s221_s12, 4  ;;  %s1016_s16 = int_to_ptr.hbm [resolvable:$true] %s1015_s16 }
  0x1d   : > { %s1017_s10 = scalar_lea.hbm %s1016_s16, 64  ;;  %p1019_p10 = pneg %p1238_p2 }
  0x1e   : > { %p1018_p9 = scmp.ne.s32.totalorder %s1016_s16, %s1017_s10  ;;  %s1022_s30 = scalar_lea.hbm %s1339_s0, 128 }
  0x1f   : > { %p1023_p0 = scmp.lt.s32.totalorder %s1016_s16, %s1339_s0  ;;  %p1024_p5 = scmp.lt.s32.totalorder %s1022_s30, %s1017_s10 }
  0x20   : > { %p1020_p12 = pnand %p1019_p10, %p1018_p9 }
  0x21   : > { %p1025_p7 = por %p1024_p5, %p1023_p0 }
  0x22   : > { %p1021_p13 = pneg %p1020_p12 }
  0x24   : > { %p1026_p11 = pnand %p1025_p7, %p1021_p13 }
  0x26   : > { %1029 = shalt.err (!%p1026_p11)
}
  0x27   : > { %s1351_s26 = smov 64   ;;  %234 = sbr.rel (%p1196_p8) target bundleno = 419 (0x1a3), region = 40 }
  0x28   : > { %904 = dma.hbm_to_vmem [thread:$0]  (!%p1238_p2), %s221_s12, 1024, %s223_s9, %s211_s15, %s1351_s26, %s1351_s26, %s1119_s11  }
  0x29   : > { %s1258_s8 = sand.u32 (!%p1196_p8), 1, %s1107_s19  }
  0x2a   : > { %s735_s16 = sshll.u32 (!%p1196_p8), %s1258_s8, 6  ;;  %s237_s10 = scalar_lea.sflag (!%p1196_p8), [#allocation3], %s1258_s8 }
  0x2b   : > { %s1262_s28 = scalar_lea.vmem (!%p1196_p8), [#allocation2], %s735_s16 }
  0x2c   : > { %1090 = dma.done.wait (%p1183_p4), %s237_s10, 1024  }
  0x2d   : > { %1092 = vsyncadd (%p1183_p4), %s237_s10, 4294966272 }
  0x2e   : > { %1094 = dma.done.wait (%p43_p1), [#allocation6], 2048  }
  0x2f   : > { %1096 = vsyncadd (%p43_p1), [#allocation6], 4294965248  ;;  %v856_v0 = vld [vmem:[#allocation5 + $0x38] sm:$0xff]  ;;  %v855_v1 = vld [vmem:[#allocation5 + $0x30] sm:$0xff]  ;;  %s738_s11 = sshll.u32 %s1258_s8, 7  ;;  %s865_s15 = sshll.u32 %s1174_s22, 7 }
  0x30   : > { %412 = vmatpush.bf16.msra.mxu0 %v856_v0  ;;  %866 = vmatpush.bf16.msra.mxu2 %v856_v0  ;;  %v854_v2 = vld [vmem:[#allocation5 + $0x28] sm:$0xff]  ;;  %v853_v3 = vld [vmem:[#allocation5 + $0x20] sm:$0xff]  ;;  %v852_v4 = vld [vmem:[#allocation5 + $0x18] sm:$0xff]  ;;  %s1287_s13 = scalar_lea.vmem [#allocation8], %s738_s11  ;;  %s630_s6 = scalar_lea.hbm %s1344_s5, %s865_s15 }
  0x31   : > { %v851_v5 = vld [vmem:[#allocation5 + $0x10] sm:$0xff]  ;;  %v850_v6 = vld [vmem:[#allocation5 + $0x8] sm:$0xff]  ;;  %v849_v7 = vld [vmem:[#allocation5] sm:$0xff]  ;;  %s631_s7 = sshll.u32 %s1287_s13, 4  ;;  %s633_s26 = sshll.u32 %s630_s6, 4  ;;  %s632_s7 = int_to_ptr.vmem [resolvable:$true] %s631_s7  ;;  %s634_s26 = int_to_ptr.hbm [resolvable:$true] %s633_s26 }
  0x32   : > { %v841_v8 = vld [vmem:[%s1262_s28] sm:$0xff]  ;;  %v842_v10 = vld [vmem:[%s1262_s28 + $0x8] sm:$0xff]  ;;  %v864_v12 = vld [vmem:[#allocation7 + $0x38] sm:$0xff]  ;;  %s619_s16 = scalar_lea.sflag [#allocation4], %s1258_s8  ;;  %s1059_s10 = sshra.s32 %s634_s26, 4  ;;  %s1060_s10 = int_to_ptr.hbm [resolvable:$true] %s1059_s10 }
  0x33   : > { %v845_v9 = vld [vmem:[%s1262_s28 + $0x20] sm:$0xff]  ;;  %v846_v11 = vld [vmem:[%s1262_s28 + $0x28] sm:$0xff]  ;;  %553 = vmatpush.bf16.msra.mxu1 %v864_v12  ;;  %v863_v13 = vld [vmem:[#allocation7 + $0x30] sm:$0xff]  ;;  %874 = vmatpush.bf16.msra.mxu3 %v864_v12  ;;  %s1065_s29 = scalar_lea.hbm %s1344_s5, 256  ;;  %p1066_p11 = scmp.lt.s32.totalorder %s1060_s10, %s1344_s5 }
  0x34   : > { %413 = vmatpush.bf16.msra.mxu0 %v855_v1  ;;  %867 = vmatpush.bf16.msra.mxu2 %v855_v1  ;;  %v862_v14 = vld [vmem:[#allocation7 + $0x28] sm:$0xff]  ;;  %v861_v15 = vld [vmem:[#allocation7 + $0x20] sm:$0xff]  ;;  %v843_v16 = vld [vmem:[%s1262_s28 + $0x10] sm:$0xff] }
  0x35   : > { %v847_v17 = vld [vmem:[%s1262_s28 + $0x30] sm:$0xff]  ;;  %v844_v18 = vld [vmem:[%s1262_s28 + $0x18] sm:$0xff]  ;;  %v858_v22 = vld [vmem:[#allocation7 + $0x8] sm:$0xff] }
  0x36   : > { %v848_v19 = vld [vmem:[%s1262_s28 + $0x38] sm:$0xff]  ;;  %v859_v21 = vld [vmem:[#allocation7 + $0x10] sm:$0xff]  ;;  %v857_v23 = vld [vmem:[#allocation7] sm:$0xff]  ;;  %s1061_s28 = scalar_lea.hbm %s1060_s10, 128 }
  0x37   : > { %554 = vmatpush.bf16.msra.mxu1 %v863_v13  ;;  %875 = vmatpush.bf16.msra.mxu3 %v863_v13  ;;  %v860_v20 = vld [vmem:[#allocation7 + $0x18] sm:$0xff]  ;;  %v953_v25 = vld [vmem:[%s1341_s2] ss:$0 sm:$0xff]  ;;  %p1062_p1 = scmp.ne.s32.totalorder %s1060_s10, %s1061_s28  ;;  %p1067_p2 = scmp.lt.s32.totalorder %s1065_s29, %s1061_s28 }
  0x38   : > { %414 = vmatpush.bf16.msra.mxu0 %v854_v2  ;;  %868 = vmatpush.bf16.msra.mxu2 %v854_v2 }
  0x39   : > { %p1063_p4 = pnand %p1062_p1, %p1225_p3  ;;  %p1068_p9 = por %p1067_p2, %p1066_p11 }
  0x3b   : > { %555 = vmatpush.bf16.msra.mxu1 %v862_v14  ;;  %876 = vmatpush.bf16.msra.mxu3 %v862_v14  ;;  %p1064_p8 = pneg %p1063_p4 }
  0x3c   : > { %415 = vmatpush.bf16.msra.mxu0 %v853_v3  ;;  %869 = vmatpush.bf16.msra.mxu2 %v853_v3 }
  0x3d   : > { %p1069_p10 = pnand %p1068_p9, %p1064_p8 }
  0x3f   : > { %556 = vmatpush.bf16.msra.mxu1 %v861_v15  ;;  %877 = vmatpush.bf16.msra.mxu3 %v861_v15 }
  0x40   : > { %416 = vmatpush.bf16.msra.mxu0 %v852_v4  ;;  %870 = vmatpush.bf16.msra.mxu2 %v852_v4 }
  0x43   : > { %557 = vmatpush.bf16.msra.mxu1 %v860_v20  ;;  %878 = vmatpush.bf16.msra.mxu3 %v860_v20 }
  0x44   : > { %417 = vmatpush.bf16.msra.mxu0 %v851_v5  ;;  %871 = vmatpush.bf16.msra.mxu2 %v851_v5 }
  0x47   : > { %558 = vmatpush.bf16.msra.mxu1 %v859_v21  ;;  %879 = vmatpush.bf16.msra.mxu3 %v859_v21 }
  0x48   : > { %418 = vmatpush.bf16.msra.mxu0 %v850_v6  ;;  %872 = vmatpush.bf16.msra.mxu2 %v850_v6 }
  0x4b   : > { %559 = vmatpush.bf16.msra.mxu1 %v858_v22  ;;  %880 = vmatpush.bf16.msra.mxu3 %v858_v22 }
  0x4c   : > { %419 = vmatpush.bf16.msra.mxu0 %v849_v7  ;;  %873 = vmatpush.bf16.msra.mxu2 %v849_v7 }
  0x4f   : > { %420 = vmatmul.bf16.vlgmr.msra.gmra.mxu0 %v841_v8  ;;  %440 = vmatmul.bf16.vlgmr.msra.gmra.mxu2 %v845_v9 }
  0x50   : > { %560 = vmatpush.bf16.msra.mxu1 %v857_v23  ;;  %881 = vmatpush.bf16.msra.mxu3 %v857_v23 }
  0x5f   : > { %425 = vmatmul.bf16.gmra.mxu0 %v842_v10  ;;  %445 = vmatmul.bf16.gmra.mxu2 %v846_v11 }
  0x6f   : > { %430 = vmatmul.bf16.gmra.mxu0 %v843_v16  ;;  %450 = vmatmul.bf16.gmra.mxu2 %v847_v17  ;;  %v954_v17 = vld [vmem:[%s1343_s4] ss:$0 sm:$0xff] }
  0x7f   : > { %435 = vmatmul.bf16.gmra.mxu0 %v844_v18  ;;  %455 = vmatmul.bf16.gmra.mxu2 %v848_v19 }
  0xcc   : > { %v421_v24 = vpop.f32.mrf.mxu0 }
  0xcd   : > { %v422_v26 = vadd.f32 %v953_v25, %v421_v24 }
  0xcf   : > { %v461_v29 = vmax.f32 %v422_v26, 0.0 }
  0xd2   : > { %v441_v27 = vpop.f32.mrf.mxu2 }
  0xd3   : > { %v442_v32 = vadd.f32 %v953_v25, %v441_v27 }
  0xd4   : > { %v423_v28 = vpop.f32.mrf.mxu0 }
  0xd5   : > { %v424_v30 = vadd.f32 %v953_v25, %v423_v28  ;;  %v469_v37 = vmax.f32 %v442_v32, 0.0 }
  0xd7   : > { %v462_v31 = vmax.f32 %v424_v30, 0.0 }
  0xd9   : > { %v477_v33 = vpack.c.bf16 %v462_v31, %v461_v29 }
  0xda   : > { %v443_v34 = vpop.f32.mrf.mxu2 }
  0xdb   : > { %v444_v35 = vadd.f32 %v953_v25, %v443_v34  ;;  %561 = vmatmul.bf16.vlgmr.msra.gmra.mxu1 %v477_v33 }
  0xdc   : > { %v426_v36 = vpop.f32.mrf.mxu0 }
  0xdd   : > { %v470_v38 = vmax.f32 %v444_v35, 0.0  ;;  %v427_v40 = vadd.f32 %v953_v25, %v426_v36 }
  0xdf   : > { %v481_v39 = vpack.c.bf16 %v470_v38, %v469_v37  ;;  %v463_v43 = vmax.f32 %v427_v40, 0.0 }
  0xe1   : > { %581 = vmatmul.bf16.vlgmr.msra.gmra.mxu3 %v481_v39 }
  0xe2   : > { %v446_v41 = vpop.f32.mrf.mxu2 }
  0xe3   : > { %v447_v46 = vadd.f32 %v953_v25, %v446_v41 }
  0xe4   : > { %v428_v42 = vpop.f32.mrf.mxu0 }
  0xe5   : > { %v429_v44 = vadd.f32 %v953_v25, %v428_v42  ;;  %v471_v51 = vmax.f32 %v447_v46, 0.0 }
  0xe7   : > { %v464_v45 = vmax.f32 %v429_v44, 0.0 }
  0xe9   : > { %v478_v47 = vpack.c.bf16 %v464_v45, %v463_v43 }
  0xea   : > { %v448_v48 = vpop.f32.mrf.mxu2 }
  0xeb   : > { %v449_v49 = vadd.f32 %v953_v25, %v448_v48  ;;  %566 = vmatmul.bf16.gmra.mxu1 %v478_v47 }
  0xec   : > { %v431_v50 = vpop.f32.mrf.mxu0 }
  0xed   : > { %v472_v52 = vmax.f32 %v449_v49, 0.0  ;;  %v432_v54 = vadd.f32 %v953_v25, %v431_v50 }
  0xef   : > { %v482_v53 = vpack.c.bf16 %v472_v52, %v471_v51  ;;  %v465_v57 = vmax.f32 %v432_v54, 0.0 }
  0xf1   : > { %586 = vmatmul.bf16.gmra.mxu3 %v482_v53 }
  0xf2   : > { %v451_v55 = vpop.f32.mrf.mxu2 }
  0xf3   : > { %v452_v60 = vadd.f32 %v953_v25, %v451_v55 }
  0xf4   : > { %v433_v56 = vpop.f32.mrf.mxu0 }
  0xf5   : > { %v434_v58 = vadd.f32 %v953_v25, %v433_v56  ;;  %v473_v1 = vmax.f32 %v452_v60, 0.0 }
  0xf7   : > { %v466_v59 = vmax.f32 %v434_v58, 0.0 }
  0xf9   : > { %v479_v61 = vpack.c.bf16 %v466_v59, %v465_v57 }
  0xfa   : > { %v453_v62 = vpop.f32.mrf.mxu2 }
  0xfb   : > { %v454_v63 = vadd.f32 %v953_v25, %v453_v62  ;;  %571 = vmatmul.bf16.gmra.mxu1 %v479_v61 }
  0xfc   : > { %v436_v0 = vpop.f32.mrf.mxu0 }
  0xfd   : > { %v474_v2 = vmax.f32 %v454_v63, 0.0  ;;  %v437_v4 = vadd.f32 %v953_v25, %v436_v0 }
  0xff   : > { %v483_v3 = vpack.c.bf16 %v474_v2, %v473_v1  ;;  %v467_v7 = vmax.f32 %v437_v4, 0.0 }
 0x101   : > { %591 = vmatmul.bf16.gmra.mxu3 %v483_v3 }
 0x102   : > { %v456_v5 = vpop.f32.mrf.mxu2 }
 0x103   : > { %v457_v10 = vadd.f32 %v953_v25, %v456_v5 }
 0x104   : > { %v438_v6 = vpop.f32.mrf.mxu0 }
 0x105   : > { %v439_v8 = vadd.f32 %v953_v25, %v438_v6  ;;  %v475_v14 = vmax.f32 %v457_v10, 0.0 }
 0x107   : > { %v468_v9 = vmax.f32 %v439_v8, 0.0 }
 0x109   : > { %v480_v11 = vpack.c.bf16 %v468_v9, %v467_v7 }
 0x10a   : > { %v458_v12 = vpop.f32.mrf.mxu2 }
 0x10b   : > { %v459_v13 = vadd.f32 %v953_v25, %v458_v12  ;;  %576 = vmatmul.bf16.gmra.mxu1 %v480_v11 }
 0x10d   : > { %v476_v15 = vmax.f32 %v459_v13, 0.0 }
 0x10f   : > { %v484_v16 = vpack.c.bf16 %v476_v15, %v475_v14 }
 0x111   : > { %596 = vmatmul.bf16.gmra.mxu3 %v484_v16 }
 0x158   : > { %v562_v18 = vpop.f32.mrf.mxu1 }
 0x159   : > { %v563_v19 = vadd.f32 %v954_v17, %v562_v18 }
 0x15b   : > { %602 = vst [vmem:[%s1287_s13] sm:$0xff] %v563_v19 }
 0x160   : > { %v564_v20 = vpop.f32.mrf.mxu1 }
 0x161   : > { %v565_v21 = vadd.f32 %v954_v17, %v564_v20 }
 0x163   : > { %603 = vst [vmem:[%s1287_s13 + $0x8] sm:$0xff] %v565_v21 }
 0x164   : > { %v582_v22 = vpop.f32.mrf.mxu3 }
 0x165   : > { %v583_v23 = vadd.f32 %v954_v17, %v582_v22 }
 0x167   : > { %610 = vst [vmem:[%s1287_s13 + $0x40] sm:$0xff] %v583_v23 }
 0x168   : > { %v567_v24 = vpop.f32.mrf.mxu1 }
 0x169   : > { %v568_v25 = vadd.f32 %v954_v17, %v567_v24 }
 0x16b   : > { %604 = vst [vmem:[%s1287_s13 + $0x10] sm:$0xff] %v568_v25 }
 0x16c   : > { %v584_v26 = vpop.f32.mrf.mxu3 }
 0x16d   : > { %v585_v27 = vadd.f32 %v954_v17, %v584_v26 }
 0x16f   : > { %611 = vst [vmem:[%s1287_s13 + $0x48] sm:$0xff] %v585_v27 }
 0x170   : > { %v569_v28 = vpop.f32.mrf.mxu1 }
 0x171   : > { %v570_v29 = vadd.f32 %v954_v17, %v569_v28 }
 0x173   : > { %605 = vst [vmem:[%s1287_s13 + $0x18] sm:$0xff] %v570_v29 }
 0x174   : > { %v587_v30 = vpop.f32.mrf.mxu3 }
 0x175   : > { %v588_v31 = vadd.f32 %v954_v17, %v587_v30 }
 0x177   : > { %612 = vst [vmem:[%s1287_s13 + $0x50] sm:$0xff] %v588_v31 }
 0x178   : > { %v572_v32 = vpop.f32.mrf.mxu1 }
 0x179   : > { %v573_v33 = vadd.f32 %v954_v17, %v572_v32 }
 0x17b   : > { %606 = vst [vmem:[%s1287_s13 + $0x20] sm:$0xff] %v573_v33 }
 0x17c   : > { %v589_v34 = vpop.f32.mrf.mxu3 }
 0x17d   : > { %v590_v35 = vadd.f32 %v954_v17, %v589_v34 }
 0x17f   : > { %613 = vst [vmem:[%s1287_s13 + $0x58] sm:$0xff] %v590_v35 }
 0x180   : > { %v574_v36 = vpop.f32.mrf.mxu1 }
 0x181   : > { %v575_v37 = vadd.f32 %v954_v17, %v574_v36 }
 0x183   : > { %607 = vst [vmem:[%s1287_s13 + $0x28] sm:$0xff] %v575_v37 }
 0x184   : > { %v592_v38 = vpop.f32.mrf.mxu3 }
 0x185   : > { %v593_v39 = vadd.f32 %v954_v17, %v592_v38 }
 0x187   : > { %614 = vst [vmem:[%s1287_s13 + $0x60] sm:$0xff] %v593_v39 }
 0x188   : > { %v577_v40 = vpop.f32.mrf.mxu1 }
 0x189   : > { %v578_v41 = vadd.f32 %v954_v17, %v577_v40 }
 0x18b   : > { %608 = vst [vmem:[%s1287_s13 + $0x30] sm:$0xff] %v578_v41 }
 0x18c   : > { %v594_v42 = vpop.f32.mrf.mxu3 }
 0x18d   : > { %v595_v43 = vadd.f32 %v954_v17, %v594_v42 }
 0x18f   : > { %615 = vst [vmem:[%s1287_s13 + $0x68] sm:$0xff] %v595_v43 }
 0x190   : > { %v579_v44 = vpop.f32.mrf.mxu1 }
 0x191   : > { %v580_v45 = vadd.f32 %v954_v17, %v579_v44 }
 0x193   : > { %609 = vst [vmem:[%s1287_s13 + $0x38] sm:$0xff] %v580_v45 }
 0x194   : > { %v597_v46 = vpop.f32.mrf.mxu3 }
 0x195   : > { %v598_v47 = vadd.f32 %v954_v17, %v597_v46 }
 0x197   : > { %616 = vst [vmem:[%s1287_s13 + $0x70] sm:$0xff] %v598_v47 }
 0x19c   : > { %v599_v48 = vpop.f32.mrf.mxu3 }
 0x19d   : > { %v600_v49 = vadd.f32 %v954_v17, %v599_v48 }
 0x19f   : > { %617 = vst [vmem:[%s1287_s13 + $0x78] sm:$0xff] %v600_v49 }
 0x1a0   : > { %1072 = shalt.err (!%p1069_p10)
}
 0x1a1   : > { %s1121_s8 = smov 128   ;;  %s1122_s12 = smov 8  }
 0x1a2   : > { %892 = dma.vmem_to_hbm [thread:$0]  (%p1225_p3), %s632_s7, 2048, %s634_s26, %s619_s16, %s1121_s8, %s1121_s8, %s1122_s12  }
 0x1a3 PF: > { %s648_s13 = sand.u32 1, %s1103_s18   ;;  %p1352_p12 = scmp.ge.s32.totalorder %s1115_s21, 2 }
 0x1a4   : > { %s649_s15 = scalar_lea.sflag [#allocation4], %s648_s13 }
 0x1a5   : > { %p906_p13 = pnand %p1352_p12, %p1188_p6 }
 0x1a7   : > { %p907_p0 = pneg %p906_p13 }
 0x1a9   : > { %1098 = dma.done.wait (%p907_p0), %s649_s15, 2048  }
 0x1aa   : > { %1100 = vsyncadd (%p907_p0), %s649_s15, 4294965248  ;;  %p19_p5 = scmp.ge.s32.totalorder %s1215_s14, 4   ;;  %s1353_s18 = smov %s1107_s19 }
 0x1ab   : > { %s1354_s19 = smov %s1111_s20  ;;  %s1355_s20 = smov %s1231_s23 }
 0x1ac   : > { %s1356_s21 = smov %s1215_s14  ;;  %21 = sbr.rel (!%p19_p5) target bundleno = 6 (0x6), region = 93 }
 0x1b1   :  { %655 = vsyncpa [#allocation3], 1 }
 0x1b2   :  { %657 = vsyncpa [#allocation3 + $0x1], 1 }
 0x1b3   :  { %658 = vsyncpa [#allocation6], 1 }
 0x1b4   :  { %659 = vsyncpa [#allocation4], 1 }
 0x1b5   :  { %661 = vsyncpa [#allocation4 + $0x1], 1 }

</bundles_post_ra>
